<compile_context>
chip_gen: v5e
topology: v5e:2x2
jax: 0.10.0
libtpu: 0.0.40
codegen_flags: <defaults>
</compile_context>

<pallas_src>
import functools

import jax
import jax.numpy as jnp
from jax import lax
from jax.experimental import pallas as pl
from jax.experimental.pallas import tpu as pltpu


def _pick_tile_q(HW):
    """Lane-dense q tiling: TILE_Q is always a multiple of 128 (or the whole
    padded extent), and the padded output-pixel extent is a multiple of it."""
    hw128 = ((HW + 127) // 128) * 128
    tile = min(512, hw128)
    hw_pad = ((HW + tile - 1) // tile) * tile
    return tile, hw_pad


def _affine_sample_kernel(mat_ref, src_ref, out_ref, *, H, W, C, TILE_Q):
    n = pl.program_id(0)
    t = pl.program_id(1)
    base = n * 6
    q0 = t * TILE_Q
    fH = float(H)
    fW = float(W)

    # theta with the module's normalization: row-0 translation / H, row-1 / W.
    t00 = mat_ref[base + 0]
    t01 = mat_ref[base + 1]
    t02 = mat_ref[base + 2] / fH
    t10 = mat_ref[base + 3]
    t11 = mat_ref[base + 4]
    t12 = mat_ref[base + 5] / fW

    # Flattened output-pixel index q = h*W + w for this tile, shape (1, TILE_Q).
    q = (lax.broadcasted_iota(jnp.int32, (1, TILE_Q), 1) + q0).astype(jnp.float32)
    # +0.5 keeps the f32 divide from rounding across an integer boundary.
    h_i = jnp.floor((q + 0.5) / fW)
    w_i = q - h_i * fW

    # affine_grid base coordinates (align_corners=False).
    bx = (2.0 * w_i + 1.0) / fW - 1.0
    by = (2.0 * h_i + 1.0) / fH - 1.0

    # Normalized sampling coordinates.
    gx = t00 * bx + t01 * by + t02
    gy = t10 * bx + t11 * by + t12

    # grid_sample un-normalization (align_corners=False).
    ix = ((gx + 1.0) * fW - 1.0) * 0.5
    iy = ((gy + 1.0) * fH - 1.0) * 0.5

    x0f = jnp.floor(ix)
    y0f = jnp.floor(iy)
    wx1 = ix - x0f
    wx0 = 1.0 - wx1
    wy1 = iy - y0f
    wy0 = 1.0 - wy1
    x0 = x0f.astype(jnp.int32)
    y0 = y0f.astype(jnp.int32)

    zero = jnp.float32(0.0)

    # Column selector (W, TILE_Q): weighted one-hots at x0 and x0+1. Samples
    # outside [0, W) never match the iota, so their contribution is 0 exactly
    # as grid_sample's zero padding requires along x.
    wi = lax.broadcasted_iota(jnp.int32, (W, TILE_Q), 0)
    colsel = jnp.where(wi == x0, wx0, zero) + jnp.where(wi == x0 + 1, wx1, zero)

    # Row selector (H, TILE_Q); same zero-padding story along y.
    hi = lax.broadcasted_iota(jnp.int32, (H, TILE_Q), 0)
    rowsel = jnp.where(hi == y0, wy0, zero) + jnp.where(hi == y0 + 1, wy1, zero)

    # Stage 1 (MXU): contract over w.  (C*H, W) @ (W, TILE_Q) -> (C*H, TILE_Q).
    src = src_ref[0]
    stage1 = jnp.dot(src, colsel, preferred_element_type=jnp.float32)

    # Stage 2 (VPU): weight by the row selector and reduce over h.
    stage1 = stage1.reshape(C, H, TILE_Q)
    out = jnp.sum(stage1 * rowsel[None, :, :], axis=1)      # (C, TILE_Q)
    out_ref[0] = out.astype(out_ref.dtype)


def affine_transformer_2d(src, mat, mode="bilinear"):
    """src: [N, C, H, W] f32, mat: [N, 2, 3] f32 -> [N, C, H, W] f32."""
    assert mode == "bilinear"  # TODO(synk): 'nearest' grid_sample mode not implemented
    N, C, H, W = src.shape
    HW = H * W
    TILE_Q, HW_pad = _pick_tile_q(HW)
    num_q_tiles = HW_pad // TILE_Q

    src_rows = src.reshape(N, C * H, W).astype(jnp.float32)
    mat_flat = mat.reshape(N * 6).astype(jnp.float32)

    kernel = functools.partial(_affine_sample_kernel, H=H, W=W, C=C, TILE_Q=TILE_Q)

    # VMEM budget (generation-aware): double-buffered src slab + out tile +
    # in-kernel temporaries (selectors, stage-1 intermediate), with headroom.
    est = (2 * C * H * W * 4                      # src slab, double buffered
           + 2 * C * TILE_Q * 4                   # out tile, double buffered
           + (W + H + 2 * C * H + 16) * TILE_Q * 4)  # selectors / stage1 / iotas
    try:
        vmem_cap = int(pltpu.get_tpu_info().vmem_capacity_bytes)
    except Exception:
        vmem_cap = 64 << 20  # conservative (v7x-sized) fallback
    vmem_limit = int(min(max(est + (4 << 20), 16 << 20), (vmem_cap * 3) // 4))

    out_flat = pl.pallas_call(
        kernel,
        out_shape=jax.ShapeDtypeStruct((N, C, HW_pad), jnp.float32),
        grid=(N, num_q_tiles),
        in_specs=[
            pl.BlockSpec(memory_space=pltpu.MemorySpace.SMEM),     # mat (scalars)
            pl.BlockSpec((1, C * H, W), lambda n, t: (n, 0, 0)),   # src slab (resident across t)
        ],
        out_specs=pl.BlockSpec((1, C, TILE_Q), lambda n, t: (n, 0, t)),
        compiler_params=pltpu.CompilerParams(
            dimension_semantics=("parallel", "parallel"),
            vmem_limit_bytes=vmem_limit,
        ),
    )(mat_flat, src_rows)

    out = out_flat[:, :, :HW] if HW_pad != HW else out_flat
    return out.reshape(N, C, H, W)


def _reference(src, mat):
    """Pure-JAX reference mirroring torch affine_grid + grid_sample (bilinear)."""
    N, C, H, W = src.shape
    HW = H * W
    norm = jnp.array([[1.0, 1.0, float(H)], [1.0, 1.0, float(W)]], jnp.float32)[None]
    theta = mat.astype(jnp.float32) / norm
    xs = (2.0 * jnp.arange(W, dtype=jnp.float32) + 1.0) / W - 1.0
    ys = (2.0 * jnp.arange(H, dtype=jnp.float32) + 1.0) / H - 1.0
    bx = jnp.broadcast_to(xs[None, :], (H, W))
    by = jnp.broadcast_to(ys[:, None], (H, W))
    gx = theta[:, 0, 0, None, None] * bx + theta[:, 0, 1, None, None] * by + theta[:, 0, 2, None, None]
    gy = theta[:, 1, 0, None, None] * bx + theta[:, 1, 1, None, None] * by + theta[:, 1, 2, None, None]
    ix = ((gx + 1.0) * W - 1.0) * 0.5
    iy = ((gy + 1.0) * H - 1.0) * 0.5
    x0 = jnp.floor(ix)
    y0 = jnp.floor(iy)
    x1 = x0 + 1.0
    y1 = y0 + 1.0
    wx1 = ix - x0
    wx0 = 1.0 - wx1
    wy1 = iy - y0
    wy0 = 1.0 - wy1
    src_flat = src.reshape(N, C, HW)

    def corner(xf, yf, w):
        x = xf.astype(jnp.int32)
        y = yf.astype(jnp.int32)
        valid = ((x >= 0) & (x < W) & (y >= 0) & (y < H)).astype(jnp.float32)
        xc = jnp.clip(x, 0, W - 1)
        yc = jnp.clip(y, 0, H - 1)
        idx = (yc * W + xc).reshape(N, 1, HW)
        vals = jnp.take_along_axis(src_flat, idx, axis=2)
        return vals * (w * valid).reshape(N, 1, HW)

    out = (corner(x0, y0, wy0 * wx0) + corner(x1, y0, wy0 * wx1)
           + corner(x0, y1, wy1 * wx0) + corner(x1, y1, wy1 * wx1))
    return out.reshape(N, C, H, W)


if __name__ == "__main__":
    key = jax.random.PRNGKey(0)
    k1, k2, k3, k4 = jax.random.split(key, 4)

    # Case 1: module-sized example (single q tile, TILE_Q == HW == 256).
    N, C, H, W = 2, 4, 16, 16
    src = jax.random.normal(k1, (N, C, H, W), dtype=jnp.float32)
    # identity affine + small perturbation; translation is in pixel-ish units
    # (the module divides the translation column by H / W).
    identity = jnp.tile(jnp.array([[1.0, 0.0, 0.0], [0.0, 1.0, 0.0]], jnp.float32), (N, 1, 1))
    mat = identity + 0.1 * jax.random.normal(k2, (N, 2, 3), dtype=jnp.float32)

    out = affine_transformer_2d(src, mat)
    jax.block_until_ready(out)
    ref = _reference(src, mat)
    assert out.shape == (N, C, H, W)
    err = float(jnp.max(jnp.abs(out - ref)))
    assert jnp.allclose(out, ref, atol=1e-4, rtol=1e-4), f"case1 max abs err {err}"

    # Case 2: exercises the multi-tile q grid (HW=1024 -> two 512-lane tiles),
    # odd channel count and larger warps that push samples out of bounds.
    N2, C2, H2, W2 = 1, 3, 32, 32
    src2 = jax.random.normal(k3, (N2, C2, H2, W2), dtype=jnp.float32)
    identity2 = jnp.tile(jnp.array([[1.0, 0.0, 0.0], [0.0, 1.0, 0.0]], jnp.float32), (N2, 1, 1))
    mat2 = identity2 + 0.2 * jax.random.normal(k4, (N2, 2, 3), dtype=jnp.float32)

    out2 = affine_transformer_2d(src2, mat2)
    jax.block_until_ready(out2)
    ref2 = _reference(src2, mat2)
    err2 = float(jnp.max(jnp.abs(out2 - ref2)))
    assert jnp.allclose(out2, ref2, atol=1e-4, rtol=1e-4), f"case2 max abs err {err2}"

    print("KERNEL_OK")
</pallas_src>

<mosaic_0001>
module attributes {stable_mosaic.version = 11 : i64} {
  func.func @_affine_sample_kernel(%arg0: i32, %arg1: i32, %arg2: memref<12xf32, #tpu.memory_space<smem>>, %arg3: memref<1x64x16xf32, #tpu.memory_space<vmem>>, %arg4: memref<1x4x256xf32, #tpu.memory_space<vmem>>) attributes {dimension_semantics = [#tpu.dimension_semantics<parallel>, #tpu.dimension_semantics<parallel>], iteration_bounds = array<i64: 2, 1>, scalar_prefetch = 0 : i64, scratch_operands = 0 : i64, tpu.core_type = #tpu.core_type<tc>, window_params = [{transform_indices = @transform_0, window_bounds = array<i64: 12>}, {transform_indices = @transform_1, window_bounds = array<i64: 1, 64, 16>}, {transform_indices = @transform_2, window_bounds = array<i64: 1, 4, 256>}]} {
    %c6_i32 = arith.constant 6 : i32
    %0 = arith.muli %arg0, %c6_i32 : i32
    %c256_i32 = arith.constant 256 : i32
    %1 = arith.muli %arg1, %c256_i32 : i32
    %c0_i32 = arith.constant 0 : i32
    %2 = arith.addi %0, %c0_i32 : i32
    %3 = arith.index_cast %2 : i32 to index
    %4 = memref.load %arg2[%3] : memref<12xf32, #tpu.memory_space<smem>>
    %c1_i32 = arith.constant 1 : i32
    %5 = arith.addi %0, %c1_i32 : i32
    %6 = arith.index_cast %5 : i32 to index
    %7 = memref.load %arg2[%6] : memref<12xf32, #tpu.memory_space<smem>>
    %c2_i32 = arith.constant 2 : i32
    %8 = arith.addi %0, %c2_i32 : i32
    %9 = arith.index_cast %8 : i32 to index
    %10 = memref.load %arg2[%9] : memref<12xf32, #tpu.memory_space<smem>>
    %cst = arith.constant 1.600000e+01 : f32
    %11 = arith.divf %10, %cst : f32
    %c3_i32 = arith.constant 3 : i32
    %12 = arith.addi %0, %c3_i32 : i32
    %13 = arith.index_cast %12 : i32 to index
    %14 = memref.load %arg2[%13] : memref<12xf32, #tpu.memory_space<smem>>
    %c4_i32 = arith.constant 4 : i32
    %15 = arith.addi %0, %c4_i32 : i32
    %16 = arith.index_cast %15 : i32 to index
    %17 = memref.load %arg2[%16] : memref<12xf32, #tpu.memory_space<smem>>
    %c5_i32 = arith.constant 5 : i32
    %18 = arith.addi %0, %c5_i32 : i32
    %19 = arith.index_cast %18 : i32 to index
    %20 = memref.load %arg2[%19] : memref<12xf32, #tpu.memory_space<smem>>
    %cst_0 = arith.constant 1.600000e+01 : f32
    %21 = arith.divf %20, %cst_0 : f32
    %22 = tpu.iota {dimensions = array<i32: 1>} : vector<1x256xi32>
    %23 = vector.broadcast %1 : i32 to vector<1x256xi32>
    %24 = arith.addi %22, %23 : vector<1x256xi32>
    %25 = arith.sitofp %24 : vector<1x256xi32> to vector<1x256xf32>
    %cst_1 = arith.constant 5.000000e-01 : f32
    %26 = vector.broadcast %cst_1 : f32 to vector<1x256xf32>
    %27 = arith.addf %25, %26 : vector<1x256xf32>
    %cst_2 = arith.constant 1.600000e+01 : f32
    %28 = vector.broadcast %cst_2 : f32 to vector<1x256xf32>
    %29 = arith.divf %27, %28 : vector<1x256xf32>
    %30 = math.floor %29 : vector<1x256xf32>
    %cst_3 = arith.constant 1.600000e+01 : f32
    %31 = vector.broadcast %cst_3 : f32 to vector<1x256xf32>
    %32 = arith.mulf %30, %31 : vector<1x256xf32>
    %33 = arith.subf %25, %32 : vector<1x256xf32>
    %cst_4 = arith.constant 2.000000e+00 : f32
    %34 = vector.broadcast %cst_4 : f32 to vector<1x256xf32>
    %35 = arith.mulf %34, %33 : vector<1x256xf32>
    %cst_5 = arith.constant 1.000000e+00 : f32
    %36 = vector.broadcast %cst_5 : f32 to vector<1x256xf32>
    %37 = arith.addf %35, %36 : vector<1x256xf32>
    %cst_6 = arith.constant 1.600000e+01 : f32
    %38 = vector.broadcast %cst_6 : f32 to vector<1x256xf32>
    %39 = arith.divf %37, %38 : vector<1x256xf32>
    %cst_7 = arith.constant 1.000000e+00 : f32
    %40 = vector.broadcast %cst_7 : f32 to vector<1x256xf32>
    %41 = arith.subf %39, %40 : vector<1x256xf32>
    %cst_8 = arith.constant 2.000000e+00 : f32
    %42 = vector.broadcast %cst_8 : f32 to vector<1x256xf32>
    %43 = arith.mulf %42, %30 : vector<1x256xf32>
    %cst_9 = arith.constant 1.000000e+00 : f32
    %44 = vector.broadcast %cst_9 : f32 to vector<1x256xf32>
    %45 = arith.addf %43, %44 : vector<1x256xf32>
    %cst_10 = arith.constant 1.600000e+01 : f32
    %46 = vector.broadcast %cst_10 : f32 to vector<1x256xf32>
    %47 = arith.divf %45, %46 : vector<1x256xf32>
    %cst_11 = arith.constant 1.000000e+00 : f32
    %48 = vector.broadcast %cst_11 : f32 to vector<1x256xf32>
    %49 = arith.subf %47, %48 : vector<1x256xf32>
    %50 = vector.broadcast %4 : f32 to vector<1x256xf32>
    %51 = arith.mulf %50, %41 : vector<1x256xf32>
    %52 = vector.broadcast %7 : f32 to vector<1x256xf32>
    %53 = arith.mulf %52, %49 : vector<1x256xf32>
    %54 = arith.addf %51, %53 : vector<1x256xf32>
    %55 = vector.broadcast %11 : f32 to vector<1x256xf32>
    %56 = arith.addf %54, %55 : vector<1x256xf32>
    %57 = vector.broadcast %14 : f32 to vector<1x256xf32>
    %58 = arith.mulf %57, %41 : vector<1x256xf32>
    %59 = vector.broadcast %17 : f32 to vector<1x256xf32>
    %60 = arith.mulf %59, %49 : vector<1x256xf32>
    %61 = arith.addf %58, %60 : vector<1x256xf32>
    %62 = vector.broadcast %21 : f32 to vector<1x256xf32>
    %63 = arith.addf %61, %62 : vector<1x256xf32>
    %cst_12 = arith.constant 1.000000e+00 : f32
    %64 = vector.broadcast %cst_12 : f32 to vector<1x256xf32>
    %65 = arith.addf %56, %64 : vector<1x256xf32>
    %cst_13 = arith.constant 1.600000e+01 : f32
    %66 = vector.broadcast %cst_13 : f32 to vector<1x256xf32>
    %67 = arith.mulf %65, %66 : vector<1x256xf32>
    %cst_14 = arith.constant 1.000000e+00 : f32
    %68 = vector.broadcast %cst_14 : f32 to vector<1x256xf32>
    %69 = arith.subf %67, %68 : vector<1x256xf32>
    %cst_15 = arith.constant 5.000000e-01 : f32
    %70 = vector.broadcast %cst_15 : f32 to vector<1x256xf32>
    %71 = arith.mulf %69, %70 : vector<1x256xf32>
    %cst_16 = arith.constant 1.000000e+00 : f32
    %72 = vector.broadcast %cst_16 : f32 to vector<1x256xf32>
    %73 = arith.addf %63, %72 : vector<1x256xf32>
    %cst_17 = arith.constant 1.600000e+01 : f32
    %74 = vector.broadcast %cst_17 : f32 to vector<1x256xf32>
    %75 = arith.mulf %73, %74 : vector<1x256xf32>
    %cst_18 = arith.constant 1.000000e+00 : f32
    %76 = vector.broadcast %cst_18 : f32 to vector<1x256xf32>
    %77 = arith.subf %75, %76 : vector<1x256xf32>
    %cst_19 = arith.constant 5.000000e-01 : f32
    %78 = vector.broadcast %cst_19 : f32 to vector<1x256xf32>
    %79 = arith.mulf %77, %78 : vector<1x256xf32>
    %80 = math.floor %71 : vector<1x256xf32>
    %81 = math.floor %79 : vector<1x256xf32>
    %82 = arith.subf %71, %80 : vector<1x256xf32>
    %cst_20 = arith.constant 1.000000e+00 : f32
    %83 = vector.broadcast %cst_20 : f32 to vector<1x256xf32>
    %84 = arith.subf %83, %82 : vector<1x256xf32>
    %85 = arith.subf %79, %81 : vector<1x256xf32>
    %cst_21 = arith.constant 1.000000e+00 : f32
    %86 = vector.broadcast %cst_21 : f32 to vector<1x256xf32>
    %87 = arith.subf %86, %85 : vector<1x256xf32>
    %88 = arith.fptosi %80 : vector<1x256xf32> to vector<1x256xi32>
    %89 = arith.fptosi %81 : vector<1x256xf32> to vector<1x256xi32>
    %90 = tpu.iota {dimensions = array<i32: 0>} : vector<16x256xi32>
    %91 = vector.broadcast %88 : vector<1x256xi32> to vector<16x256xi32>
    %92 = arith.cmpi eq, %90, %91 : vector<16x256xi32>
    %cst_22 = arith.constant 0.000000e+00 : f32
    %93 = vector.shape_cast %84 : vector<1x256xf32> to vector<1x256xf32>
    %94 = vector.broadcast %93 : vector<1x256xf32> to vector<16x256xf32>
    %95 = vector.broadcast %cst_22 : f32 to vector<16x256xf32>
    %96 = arith.select %92, %94, %95 : vector<16x256xi1>, vector<16x256xf32>
    %c1_i32_23 = arith.constant 1 : i32
    %97 = vector.broadcast %c1_i32_23 : i32 to vector<1x256xi32>
    %98 = arith.addi %88, %97 : vector<1x256xi32>
    %99 = vector.broadcast %98 : vector<1x256xi32> to vector<16x256xi32>
    %100 = arith.cmpi eq, %90, %99 : vector<16x256xi32>
    %cst_24 = arith.constant 0.000000e+00 : f32
    %101 = vector.shape_cast %82 : vector<1x256xf32> to vector<1x256xf32>
    %102 = vector.broadcast %101 : vector<1x256xf32> to vector<16x256xf32>
    %103 = vector.broadcast %cst_24 : f32 to vector<16x256xf32>
    %104 = arith.select %100, %102, %103 : vector<16x256xi1>, vector<16x256xf32>
    %105 = arith.addf %96, %104 : vector<16x256xf32>
    %106 = tpu.iota {dimensions = array<i32: 0>} : vector<16x256xi32>
    %107 = vector.broadcast %89 : vector<1x256xi32> to vector<16x256xi32>
    %108 = arith.cmpi eq, %106, %107 : vector<16x256xi32>
    %cst_25 = arith.constant 0.000000e+00 : f32
    %109 = vector.shape_cast %87 : vector<1x256xf32> to vector<1x256xf32>
    %110 = vector.broadcast %109 : vector<1x256xf32> to vector<16x256xf32>
    %111 = vector.broadcast %cst_25 : f32 to vector<16x256xf32>
    %112 = arith.select %108, %110, %111 : vector<16x256xi1>, vector<16x256xf32>
    %c1_i32_26 = arith.constant 1 : i32
    %113 = vector.broadcast %c1_i32_26 : i32 to vector<1x256xi32>
    %114 = arith.addi %89, %113 : vector<1x256xi32>
    %115 = vector.broadcast %114 : vector<1x256xi32> to vector<16x256xi32>
    %116 = arith.cmpi eq, %106, %115 : vector<16x256xi32>
    %cst_27 = arith.constant 0.000000e+00 : f32
    %117 = vector.shape_cast %85 : vector<1x256xf32> to vector<1x256xf32>
    %118 = vector.broadcast %117 : vector<1x256xf32> to vector<16x256xf32>
    %119 = vector.broadcast %cst_27 : f32 to vector<16x256xf32>
    %120 = arith.select %116, %118, %119 : vector<16x256xi1>, vector<16x256xf32>
    %121 = arith.addf %112, %120 : vector<16x256xf32>
    %c0 = arith.constant 0 : index
    %c0_28 = arith.constant 0 : index
    %c0_29 = arith.constant 0 : index
    %122 = vector.load %arg3[%c0, %c0_28, %c0_29] : memref<1x64x16xf32, #tpu.memory_space<vmem>>, vector<1x64x16xf32>
    %123 = vector.shape_cast %122 : vector<1x64x16xf32> to vector<64x16xf32>
    %cst_30 = arith.constant dense<0.000000e+00> : vector<64x256xf32>
    %124 = tpu.matmul %123, %105, %cst_30 {dimension_numbers = #tpu.dot_dimension_numbers<[1], [0], [0], [1], [0, 0, 1, 1], [], []>} : vector<64x16xf32>, vector<16x256xf32>, vector<64x256xf32> -> vector<64x256xf32>
    %125 = vector.shape_cast %124 : vector<64x256xf32> to vector<4x16x256xf32>
    %126 = vector.shape_cast %121 : vector<16x256xf32> to vector<1x16x256xf32>
    %127 = vector.broadcast %126 : vector<1x16x256xf32> to vector<4x16x256xf32>
    %128 = arith.mulf %125, %127 : vector<4x16x256xf32>
    %cst_31 = arith.constant dense<0.000000e+00> : vector<4x256xf32>
    %129 = vector.multi_reduction <add>, %128, %cst_31 [1] : vector<4x16x256xf32> to vector<4x256xf32>
    %c0_32 = arith.constant 0 : index
    %c0_33 = arith.constant 0 : index
    %c0_34 = arith.constant 0 : index
    %130 = vector.load %arg4[%c0_32, %c0_33, %c0_34] : memref<1x4x256xf32, #tpu.memory_space<vmem>>, vector<1x4x256xf32>
    %131 = vector.shape_cast %130 : vector<1x4x256xf32> to vector<4x256xf32>
    %132 = vector.shape_cast %129 : vector<4x256xf32> to vector<1x4x256xf32>
    tpu.vector_store %arg4[%c0_32, %c0_33, %c0_34], %132 {strides = array<i32>} : memref<1x4x256xf32, #tpu.memory_space<vmem>>, vector<1x4x256xf32>,
    return
  }
  func.func @transform_0(%arg0: i32, %arg1: i32) -> i32 {
    %c0_i32 = arith.constant 0 : i32
    %c0_i32_0 = arith.constant 0 : i32
    return %c0_i32 : i32
  }
  func.func @transform_1(%arg0: i32, %arg1: i32) -> (i32, i32, i32) {
    %c0_i32 = arith.constant 0 : i32
    %c0_i32_0 = arith.constant 0 : i32
    %c0_i32_1 = arith.constant 0 : i32
    return %arg0, %c0_i32, %c0_i32_0 : i32, i32, i32
  }
  func.func @transform_2(%arg0: i32, %arg1: i32) -> (i32, i32, i32) {
    %c0_i32 = arith.constant 0 : i32
    %c0_i32_0 = arith.constant 0 : i32
    return %arg0, %c0_i32, %arg1 : i32, i32, i32
  }
}

</mosaic_0001>

<bundles_post_ra>
// kernel: tpu_custom_call.1
= control target key start
LH: loop header
LB: loop body
LE: loop exit
PB: predicated region body
PF: predicated region fallthrough
CT: control target
= control target key end

     0   :  { %7 = vsyncpa [#allocation4], 0  ;;  %s1109_s0 = inlined_call_operand.vmem [shape: f32[12], index: 0, kind: input, shape index: {}]   ;;  %s1110_s1 = inlined_call_operand.vmem [shape: f32[2,64,16], index: 1, kind: input, shape index: {}]   ;;  %s1111_s2 = inlined_call_operand.hbm [shape: f32[2,4,256], index: 2, kind: output, shape index: {}]  }
   0x1   :  { %8 = vsyncpa [#allocation3], 0 }
   0x2   :  { %10 = vsyncpa [#allocation3 + $0x1], 0  ;;  %s906_s9 = smov 0   ;;  %s908_s10 = smov 0  }
   0x3   :  { %s910_s11 = smov 0   ;;  %s912_s12 = smov 0  }
   0x4   :  { %s914_s13 = smov 0   ;;  %s916_s14 = smov 0  }
   0x5 LB: > { %s666_s15 = sadd.s32 4294967295, %s887_s14   ;;  %s667_s16 = sadd.s32 4294967294, %s887_s14   ;;  %s887_s14 = sphi %s916_s14, %s16_s14   ;;  %s883_s13 = sphi %s914_s13, %s1118_s13   ;;  %s879_s12 = sphi %s912_s12, %s1117_s12   ;;  %s875_s11 = sphi %s910_s11, %s1116_s11   ;;  %s871_s10 = sphi %s908_s10, %s1115_s10   ;;  %s867_s9 = sphi %s906_s9, %s1114_s9  }
   0x6   : > { %s28_s17 = sadd.s32 1, %s883_s13  ;;  %s84_s18 = sadd.s32 1, %s875_s11 }
   0x7   : > { %p30_p0 = scmp.ge.s32.totalorder %s28_s17, 2  ;;  %p94_p1 = scmp.ne.s32.totalorder %s875_s11, %s871_s10 }
   0x8   : > { %p95_p2 = scmp.eq.s32.totalorder %s666_s15, 1  ;;  %p100_p3 = scmp.ne.s32.totalorder %s871_s10, %s867_s9 }
   0x9   : > { %s1120_s17 = smov (%p30_p0, %s28_s17), 0  ;;  %p101_p5 = scmp.eq.s32.totalorder %s667_s16, 1 }
   0xa   : > { %p946_p4 = por %p95_p2, %p94_p1  ;;  %s79_s20 = ssub.s32 %s883_s13, %s1120_s17 }
   0xb   : > { %p668_p6 = scmp.ge.s32.totalorder %s887_s14, 1  ;;  %p82_p7 = scmp.eq.s32.totalorder %s79_s20, 0 }
   0xc   : > { %p953_p8 = por %p101_p5, %p100_p3  ;;  %p108_p9 = scmp.lt.s32.totalorder %s887_s14, 3 }
   0xd   : > { %s959_s22 = scalar_select %p82_p7, %s875_s11, %s84_s18  }
   0xe   : > { %p109_p10 = pnand %p668_p6, %p108_p9  ;;  %p735_p11 = scmp.eq.s32.totalorder %s666_s15, 0 }
   0xf   : > { %s120_s25 = sshll.u32 %s1109_s0, 4  ;;  %s889_s26 = smov [#allocation2]   ;;  %s121_s25 = int_to_ptr.vmem [resolvable:$true] %s120_s25 }
  0x10   : > { %p727_p12 = pneg %p109_p10  ;;  %141 = sbr.rel (%p109_p10) target bundleno = 301 (0x12d), region = 28 }
  0x12   : > { %p728_p13 = pnand %p735_p11, %p727_p12 }
  0x14   : > { %730 = dma.vmem_to_smem (!%p728_p13), %s121_s25, 16, %s889_s26, [#allocation4]  }
  0x15   : > { %858 = dma.done.wait (%p735_p11), [#allocation4], 16  }
  0x16   : > { %860 = vsyncadd (%p735_p11), [#allocation4], 4294967280 }
  0x17   : > { %148 = sfence }
  0x18   : > { %v890_v0 = vmov 16.0   ;;  %v202_v3 = vlaneseq  ;;  %s966_s27 = smul.u32 6, %s879_s12  ;;  %p165_p0 = scmp.lt.s32.totalorder %s879_s12, 1  ;;  %vm352_vm1 = vcmask 130048  }
  0x19   : > { %788 = vrcp.f32 %v890_v0 }
  0x1a   : > { %v203_v5 = vand.u32 127, %v202_v3  ;;  %s187_s28 = sadd.s32 3, %s966_s27  ;;  %s189_s29 = sadd.s32 4, %s966_s27 }
  0x1b   : > { %s188_s30 = sld [smem:[#allocation2 + %s187_s28]]  ;;  %s174_s4 = sadd.s32 1, %s966_s27 }
  0x1c   : > { %v204_v7 = vadd.s32 128, %v203_v5  ;;  %v208_v9 = vcvt.s32.f32 %v203_v5  ;;  %s190_s3 = sld [smem:[#allocation2 + %s189_s29]]  ;;  %s176_s7 = sadd.s32 2, %s966_s27 }
  0x1d   : > { %s173_s5 = sld [smem:[#allocation2 + %s966_s27]]  ;;  %s191_s8 = sadd.s32 5, %s966_s27 }
  0x1e   : > { %v209_v10 = vcvt.s32.f32 %v204_v7  ;;  %v210_v12 = vadd.f32 0.5, %v208_v9  ;;  %s175_s6 = sld [smem:[#allocation2 + %s174_s4]]  ;;  %v975_v7 = vshrl.u32 %v202_v3, 7  ;;  %s162_s29 = sand.u32 1, %s871_s10  }
  0x1f   : > { %v789_v1 = vpop.eup %788  ;;  %s177_s15 = sld [smem:[#allocation2 + %s176_s7]] }
  0x20   : > { %v179_v2 = vmul.f32 16.0, %v789_v1  ;;  %vm183_vm0 = vweird.f32 %v789_v1  ;;  %v211_v13 = vadd.f32 0.5, %v209_v10  ;;  %s192_s16 = sld [smem:[#allocation2 + %s191_s8]] }
  0x21   : > { %v254_v38 = vstv %s188_s30  ;;  %s982_s24 = scalar_select %p165_p0, %s879_s12, 1 }
  0x22   : > { %v180_v4 = vsub.f32 1.0, %v179_v2  ;;  %v257_v39 = vstv %s190_s3  ;;  %s673_s30 = sshll.u32 %s162_s29, 3  ;;  %s706_s3 = sshll.u32 %s879_s12, 3 }
  0x23   : > { %v243_v46 = vstv %s173_s5  ;;  %s705_s25 = sshll.u32 %s982_s24, 6  ;;  %s164_s12 = scalar_lea.vmem [#allocation5], %s673_s30 }
  0x24   : > { %v181_v6 = vmul.f32 %v789_v1, %v180_v4  ;;  %v246_v47 = vstv %s175_s6  ;;  %s1000_s28 = scalar_lea.vmem %s1110_s1, %s705_s25  ;;  %s579_s6 = scalar_lea.hbm %s1111_s2, %s706_s3 }
  0x25   : > { %s581_s7 = sshll.u32 %s164_s12, 4  ;;  %s583_s8 = sshll.u32 %s579_s6, 4  ;;  %s582_s7 = int_to_ptr.vmem [resolvable:$true] %s581_s7  ;;  %s584_s8 = int_to_ptr.hbm [resolvable:$true] %s583_s8 }
  0x26   : > { %v182_v8 = vadd.f32 %v789_v1, %v181_v6  ;;  %s825_s24 = scalar_lea.hbm %s1111_s2, 16 }
  0x28   : > { %v184_v11 = vsel %vm183_vm0, %v789_v1, %v182_v8 }
  0x29   : > { %711 = vpush %v184_v11  ;;  %v219_v14 = vmul.f32 %v210_v12, %v184_v11  ;;  %v220_v15 = vmul.f32 %v211_v13, %v184_v11 }
  0x2b   : > { %v221_v16 = vfloor.f32 %v219_v14  ;;  %v222_v17 = vfloor.f32 %v220_v15 }
  0x2d   : > { %v223_v18 = vmul.f32 16.0, %v221_v16  ;;  %v224_v19 = vmul.f32 16.0, %v222_v17  ;;  %v235_v24 = vmul.f32 2.0, %v221_v16  ;;  %v236_v25 = vmul.f32 2.0, %v222_v17 }
  0x2e   : > { %v979_v16 = vadd.s32 8, %v975_v7 }
  0x2f   : > { %v225_v20 = vsub.f32 %v208_v9, %v223_v18  ;;  %v226_v21 = vsub.f32 %v209_v10, %v224_v19  ;;  %v237_v28 = vadd.f32 1.0, %v235_v24  ;;  %v238_v29 = vadd.f32 1.0, %v236_v25 }
  0x31   : > { %v227_v22 = vmul.f32 2.0, %v225_v20  ;;  %v228_v23 = vmul.f32 2.0, %v226_v21  ;;  %v239_v32 = vmul.f32 %v237_v28, %v184_v11  ;;  %v240_v33 = vmul.f32 %v238_v29, %v184_v11 }
  0x33   : > { %v229_v26 = vadd.f32 1.0, %v227_v22  ;;  %v230_v27 = vadd.f32 1.0, %v228_v23  ;;  %v678_v36 = vadd.f32 -1.0, %v239_v32  ;;  %v679_v37 = vadd.f32 -1.0, %v240_v33 }
  0x35   : > { %v231_v30 = vmul.f32 %v229_v26, %v184_v11  ;;  %v232_v31 = vmul.f32 %v230_v27, %v184_v11  ;;  %v258_v42 = vmul.f32 %v678_v36, %v257_v39  ;;  %v259_v43 = vmul.f32 %v679_v37, %v257_v39 }
  0x36   : > { %v247_v50 = vmul.f32 %v678_v36, %v246_v47  ;;  %v248_v51 = vmul.f32 %v679_v37, %v246_v47 }
  0x37   : > { %v676_v34 = vadd.f32 -1.0, %v231_v30  ;;  %v677_v35 = vadd.f32 -1.0, %v232_v31 }
  0x39   : > { %v255_v40 = vmul.f32 %v676_v34, %v254_v38  ;;  %v256_v41 = vmul.f32 %v677_v35, %v254_v38  ;;  %v244_v48 = vmul.f32 %v676_v34, %v243_v46  ;;  %v245_v49 = vmul.f32 %v677_v35, %v243_v46  ;;  %v348_v46 = vld [vmem:[%s1000_s28 + $0x20] sm:$0xff] }
  0x3b   : > { %v260_v44 = vadd.f32 %v258_v42, %v255_v40  ;;  %v261_v45 = vadd.f32 %v259_v43, %v256_v41  ;;  %v249_v52 = vadd.f32 %v247_v50, %v244_v48  ;;  %v250_v53 = vadd.f32 %v248_v51, %v245_v49 }
  0x5a   : > { %s712_s18 = spop %711 }
  0x5b   : > { %s186_s20 = smul.f32 %s712_s18, %s177_s15  ;;  %s566_s15 = scalar_lea.sflag [#allocation3], %s162_s29 }
  0x5c   : > { %s201_s23 = smul.f32 %s712_s18, %s192_s16  ;;  %s819_s16 = sshra.s32 %s584_s8, 4  ;;  %s820_s16 = int_to_ptr.hbm [resolvable:$true] %s819_s16 }
  0x5d   : > { %v251_v54 = vstv %s186_s20  ;;  %s821_s18 = scalar_lea.hbm %s820_s16, 8  ;;  %p826_p5 = scmp.lt.s32.totalorder %s820_s16, %s1111_s2 }
  0x5e   : > { %v252_v55 = vadd.f32 %v251_v54, %v249_v52  ;;  %v253_v56 = vadd.f32 %v251_v54, %v250_v53  ;;  %v262_v57 = vstv %s201_s23  ;;  %p822_p1 = scmp.ne.s32.totalorder %s820_s16, %s821_s18  ;;  %p827_p6 = scmp.lt.s32.totalorder %s825_s24, %s821_s18 }
  0x5f   : > { %v263_v58 = vadd.f32 %v262_v57, %v260_v44  ;;  %v264_v59 = vadd.f32 %v262_v57, %v261_v45  ;;  %v344_v45 = vld [vmem:[%s1000_s28] sm:$0xff] }
  0x60   : > { %v265_v60 = vadd.f32 1.0, %v252_v55  ;;  %v266_v61 = vadd.f32 1.0, %v253_v56  ;;  %p823_p2 = pnand %p822_p1, %p946_p4  ;;  %p828_p7 = por %p827_p6, %p826_p5 }
  0x61   : > { %v273_v62 = vadd.f32 1.0, %v263_v58  ;;  %v274_v63 = vadd.f32 1.0, %v264_v59 }
  0x62   : > { %v267_v0 = vmul.f32 16.0, %v265_v60  ;;  %v268_v1 = vmul.f32 16.0, %v266_v61  ;;  %v345_v60 = vld [vmem:[%s1000_s28 + $0x8] sm:$0xff]  ;;  %p824_p3 = pneg %p823_p2 }
  0x63   : > { %v275_v2 = vmul.f32 16.0, %v273_v62  ;;  %v276_v4 = vmul.f32 16.0, %v274_v63  ;;  %v349_v61 = vld [vmem:[%s1000_s28 + $0x28] sm:$0xff]  ;;  %v346_v62 = vld [vmem:[%s1000_s28 + $0x10] sm:$0xff] }
  0x64   : > { %v680_v5 = vadd.f32 -1.0, %v267_v0  ;;  %v681_v6 = vadd.f32 -1.0, %v268_v1  ;;  %v350_v63 = vld [vmem:[%s1000_s28 + $0x30] sm:$0xff]  ;;  %v347_v0 = vld [vmem:[%s1000_s28 + $0x18] sm:$0xff]  ;;  %p829_p9 = pnand %p828_p7, %p824_p3 }
  0x65   : > { %v682_v8 = vadd.f32 -1.0, %v275_v2  ;;  %v683_v9 = vadd.f32 -1.0, %v276_v4  ;;  %v351_v1 = vld [vmem:[%s1000_s28 + $0x38] sm:$0xff] }
  0x66   : > { %v271_v10 = vmul.f32 0.5, %v680_v5  ;;  %v272_v11 = vmul.f32 0.5, %v681_v6 }
  0x67   : > { %v279_v12 = vmul.f32 0.5, %v682_v8  ;;  %v280_v13 = vmul.f32 0.5, %v683_v9 }
  0x68   : > { %v281_v14 = vfloor.f32 %v271_v10  ;;  %v282_v15 = vfloor.f32 %v272_v11 }
  0x69   : > { %v283_v17 = vfloor.f32 %v279_v12  ;;  %v284_v18 = vfloor.f32 %v280_v13 }
  0x6a   : > { %v285_v19 = vsub.f32 %v271_v10, %v281_v14  ;;  %v286_v20 = vsub.f32 %v272_v11, %v282_v15  ;;  %v714_v3 = vcvt.f32.s32 %v281_v14  ;;  %v716_v21 = vcvt.f32.s32 %v282_v15 }
  0x6b   : > { %v289_v22 = vsub.f32 %v279_v12, %v283_v17  ;;  %v984_v23 = vsub.f32 %v280_v13, %v284_v18  ;;  %v718_v24 = vcvt.f32.s32 %v283_v17  ;;  %v986_v25 = vcvt.f32.s32 %v284_v18 }
  0x6c   : > { %v287_v26 = vsub.f32 1.0, %v285_v19  ;;  %vm302_vm2 = vcmp.eq.s32.totalorder %v979_v16, %v714_v3  ;;  %v308_v27 = vadd.s32 1, %v714_v3  ;;  %v288_v28 = vsub.f32 1.0, %v286_v20 }
  0x6d   : > { %v291_v29 = vsub.f32 1.0, %v289_v22  ;;  %v292_v30 = vsub.f32 1.0, %v984_v23  ;;  %vm303_vm3 = vcmp.eq.s32.totalorder %v979_v16, %v716_v21  ;;  %v309_v31 = vadd.s32 1, %v716_v21 }
  0x6e   : > { %v306_v32 = vsel %vm302_vm2, %v287_v26, 0.0  ;;  %vm312_vm4 = vcmp.eq.s32.totalorder %v979_v16, %v308_v27  ;;  %v307_v33 = vsel %vm303_vm3, %v288_v28, 0.0  ;;  %vm300_vm5 = vcmp.eq.s32.totalorder %v975_v7, %v714_v3 }
  0x6f   : > { %v316_v34 = vsel %vm312_vm4, %v285_v19, 0.0  ;;  %vm313_vm6 = vcmp.eq.s32.totalorder %v979_v16, %v309_v31  ;;  %v304_v35 = vsel %vm300_vm5, %v287_v26, 0.0  ;;  %vm310_vm7 = vcmp.eq.s32.totalorder %v975_v7, %v308_v27 }
  0x70   : > { %v320_v36 = vadd.f32 %v316_v34, %v306_v32  ;;  %v317_v37 = vsel %vm313_vm6, %v286_v20, 0.0  ;;  %v314_v38 = vsel %vm310_vm7, %v285_v19, 0.0  ;;  %vm301_vm8 = vcmp.eq.s32.totalorder %v975_v7, %v716_v21 }
  0x71   : > { %v321_v39 = vadd.f32 %v317_v37, %v307_v33  ;;  %v318_v40 = vadd.f32 %v314_v38, %v304_v35  ;;  %v305_v41 = vsel %vm301_vm8, %v288_v28, 0.0  ;;  %vm311_vm9 = vcmp.eq.s32.totalorder %v975_v7, %v309_v31 }
  0x72   : > { %391 = vmatpush.msra.mxu0 %v320_v36  ;;  %707 = vmatpush.msra.mxu2 %v320_v36  ;;  %v315_v42 = vsel %vm311_vm9, %v286_v20, 0.0  ;;  %vm322_vm10 = vcmp.eq.s32.totalorder %v975_v7, %v718_v24  ;;  %v330_v43 = vadd.s32 1, %v718_v24  ;;  %vm323_vm11 = vcmp.eq.s32.totalorder %v975_v7, %v986_v25 }
  0x73   : > { %432 = vmatpush.msra.mxu1 %v321_v39  ;;  %709 = vmatpush.msra.mxu3 %v321_v39  ;;  %v319_v44 = vadd.f32 %v315_v42, %v305_v41  ;;  %v326_v47 = vsel %vm322_vm10, %v291_v29, 0.0  ;;  %v327_v48 = vsel %vm323_vm11, %v292_v30, 0.0  ;;  %v331_v49 = vadd.s32 1, %v986_v25 }
  0x74   : > { %392 = vmatpush.msra.mxu0 %v318_v40  ;;  %708 = vmatpush.msra.mxu2 %v318_v40  ;;  %vm332_vm12 = vcmp.eq.s32.totalorder %v975_v7, %v330_v43  ;;  %vm324_vm13 = vcmp.eq.s32.totalorder %v979_v16, %v718_v24  ;;  %vm334_vm14 = vcmp.eq.s32.totalorder %v979_v16, %v330_v43  ;;  %vm549_vm3 = vcmask 1041409  }
  0x75   : > { %433 = vmatpush.msra.mxu1 %v319_v44  ;;  %710 = vmatpush.msra.mxu3 %v319_v44  ;;  %v336_v50 = vsel %vm332_vm12, %v289_v22, 0.0  ;;  %vm333_vm15 = vcmp.eq.s32.totalorder %v975_v7, %v331_v49  ;;  %v328_v51 = vsel %vm324_vm13, %v291_v29, 0.0  ;;  %v338_v52 = vsel %vm334_vm14, %v289_v22, 0.0 }
  0x76   : > { %684 = vmatmul.msk.f32.vlgmr.msra.gmra.mxu0 %vm352_vm1, %v344_v45  ;;  %688 = vmatmul.msk.f32.vlgmr.msra.gmra.mxu2 %vm352_vm1, %v348_v46  ;;  %v1015_v53 = vadd.f32 %v336_v50, %v326_v47  ;;  %v337_v54 = vsel %vm333_vm15, %v984_v23, 0.0  ;;  %v1018_v55 = vadd.f32 %v338_v52, %v328_v51  ;;  %vm325_vm0 = vcmp.eq.s32.totalorder %v979_v16, %v986_v25 }
  0x77   : > { %692 = vmatmul.msk.f32.vlgmr.msra.gmra.mxu1 %vm352_vm1, %v344_v45  ;;  %696 = vmatmul.msk.f32.vlgmr.msra.gmra.mxu3 %vm352_vm1, %v348_v46  ;;  %v1024_v56 = vadd.f32 %v337_v54, %v327_v48  ;;  %v329_v57 = vsel %vm325_vm0, %v292_v30, 0.0  ;;  %vm335_vm2 = vcmp.eq.s32.totalorder %v979_v16, %v331_v49  ;;  %vm551_vm4 = vcmask 1045509  }
  0x78   : > { %v339_v58 = vsel %vm335_vm2, %v984_v23, 0.0  ;;  %vm554_vm5 = vcmask 1042434   ;;  %vm556_vm6 = vcmask 1046534   ;;  %vm559_vm7 = vcmask 1043459  }
  0x79   : > { %v1028_v59 = vadd.f32 %v339_v58, %v329_v57  ;;  %vm561_vm8 = vcmask 1047559  }
  0x7e   : > { %685 = vmatmul.msk.f32.gmra.mxu0 %vm352_vm1, %v345_v60  ;;  %689 = vmatmul.msk.f32.gmra.mxu2 %vm352_vm1, %v349_v61 }
  0x7f   : > { %693 = vmatmul.msk.f32.gmra.mxu1 %vm352_vm1, %v345_v60  ;;  %697 = vmatmul.msk.f32.gmra.mxu3 %vm352_vm1, %v349_v61 }
  0x86   : > { %686 = vmatmul.msk.f32.gmra.mxu0 %vm352_vm1, %v346_v62  ;;  %690 = vmatmul.msk.f32.gmra.mxu2 %vm352_vm1, %v350_v63 }
  0x87   : > { %694 = vmatmul.msk.f32.gmra.mxu1 %vm352_vm1, %v346_v62  ;;  %698 = vmatmul.msk.f32.gmra.mxu3 %vm352_vm1, %v350_v63 }
  0x8e   : > { %687 = vmatmul.msk.f32.gmra.mxu0 %vm352_vm1, %v347_v0  ;;  %691 = vmatmul.msk.f32.gmra.mxu2 %vm352_vm1, %v351_v1 }
  0x8f   : > { %695 = vmatmul.msk.f32.gmra.mxu1 %vm352_vm1, %v347_v0  ;;  %699 = vmatmul.msk.f32.gmra.mxu3 %vm352_vm1, %v351_v1  ;;  %vm543_vm1 = vcmask 1043456  }
  0xf3   : > { %v394_v2 = vpop.f32.mrf.mxu0 }
  0xf4   : > { %v435_v4 = vpop.f32.mrf.mxu1  ;;  %v459_v8 = vmul.f32 %v394_v2, %v1015_v53 }
  0xf5   : > { %v460_v11 = vmul.f32 %v435_v4, %v1024_v56 }
  0xf9   : > { %v406_v5 = vpop.f32.mrf.mxu2 }
  0xfa   : > { %v447_v6 = vpop.f32.mrf.mxu3  ;;  %v467_v18 = vmul.f32 %v406_v5, %v1015_v53 }
  0xfb   : > { %v397_v7 = vpop.f32.mrf.mxu0  ;;  %v468_v21 = vmul.f32 %v447_v6, %v1024_v56 }
  0xfc   : > { %v461_v9 = vmul.f32 %v397_v7, %v1018_v55  ;;  %v438_v10 = vpop.f32.mrf.mxu1 }
  0xfd   : > { %v462_v12 = vmul.f32 %v438_v10, %v1028_v59 }
  0xfe   : > { %v475_v13 = vadd.f32 %v461_v9, %v459_v8 }
  0xff   : > { %v482_v14 = vadd.f32 %v462_v12, %v460_v11 }
 0x100   : > { %v476_v15 = vrot.slane %v475_v13, 4 }
 0x101   : > { %v483_v16 = vrot.slane %v482_v14, 4  ;;  %v409_v17 = vpop.f32.mrf.mxu2 }
 0x102   : > { %v477_v19 = vadd.f32 %v476_v15, %v475_v13  ;;  %v469_v20 = vmul.f32 %v409_v17, %v1018_v55  ;;  %v450_v3 = vpop.f32.mrf.mxu3 }
 0x103   : > { %v484_v22 = vadd.f32 %v483_v16, %v482_v14  ;;  %v470_v23 = vmul.f32 %v450_v3, %v1028_v59  ;;  %v400_v24 = vpop.f32.mrf.mxu0 }
 0x104   : > { %v478_v25 = vrot.slane %v477_v19, 2  ;;  %v503_v26 = vadd.f32 %v469_v20, %v467_v18  ;;  %v441_v27 = vpop.f32.mrf.mxu1  ;;  %v463_v45 = vmul.f32 %v400_v24, %v1015_v53 }
 0x105   : > { %v485_v28 = vrot.slane %v484_v22, 2  ;;  %v510_v29 = vadd.f32 %v470_v23, %v468_v21  ;;  %v464_v46 = vmul.f32 %v441_v27, %v1024_v56 }
 0x106   : > { %v479_v30 = vadd.f32 %v478_v25, %v477_v19  ;;  %v504_v31 = vrot.slane %v503_v26, 4 }
 0x107   : > { %v486_v32 = vadd.f32 %v485_v28, %v484_v22  ;;  %v511_v33 = vrot.slane %v510_v29, 4 }
 0x108   : > { %v505_v34 = vadd.f32 %v504_v31, %v503_v26  ;;  %v480_v35 = vrot.slane %v479_v30, 1 }
 0x109   : > { %v487_v36 = vrot.slane %v486_v32, 1  ;;  %v512_v37 = vadd.f32 %v511_v33, %v510_v29  ;;  %v412_v38 = vpop.f32.mrf.mxu2 }
 0x10a   : > { %v506_v39 = vrot.slane %v505_v34, 2  ;;  %v453_v40 = vpop.f32.mrf.mxu3  ;;  %v481_v49 = vadd.f32 %v480_v35, %v479_v30  ;;  %v471_v2 = vmul.f32 %v412_v38, %v1015_v53 }
 0x10b   : > { %v488_v41 = vadd.f32 %v487_v36, %v486_v32  ;;  %v513_v42 = vrot.slane %v512_v37, 2  ;;  %v403_v43 = vpop.f32.mrf.mxu0  ;;  %v472_v4 = vmul.f32 %v453_v40, %v1024_v56 }
 0x10c   : > { %v507_v44 = vadd.f32 %v506_v39, %v505_v34  ;;  %v465_v47 = vmul.f32 %v403_v43, %v1018_v55  ;;  %v444_v48 = vpop.f32.mrf.mxu1 }
 0x10d   : > { %v539_v50 = vrot.slane %v488_v41, 4  ;;  %v514_v51 = vadd.f32 %v513_v42, %v512_v37  ;;  %v466_v52 = vmul.f32 %v444_v48, %v1028_v59 }
 0x10e   : > { %v489_v54 = vadd.f32 %v465_v47, %v463_v45  ;;  %v508_v57 = vrot.slane %v507_v44, 1 }
 0x10f   : > { %v515_v58 = vrot.slane %v514_v51, 1  ;;  %v496_v60 = vadd.f32 %v466_v52, %v464_v46  ;;  %v544_v61 = vsel %vm543_vm1, %v481_v49, %v539_v50 }
 0x110   : > { %v490_v62 = vrot.slane %v489_v54, 4  ;;  %v509_v8 = vadd.f32 %v508_v57, %v507_v44 }
 0x111   : > { %v516_v63 = vadd.f32 %v515_v58, %v514_v51  ;;  %v497_v0 = vrot.slane %v496_v60, 4  ;;  %v415_v1 = vpop.f32.mrf.mxu2 }
 0x112   : > { %v491_v5 = vadd.f32 %v490_v62, %v489_v54  ;;  %v473_v6 = vmul.f32 %v415_v1, %v1018_v55  ;;  %v456_v7 = vpop.f32.mrf.mxu3 }
 0x113   : > { %v541_v9 = vrot.slane %v516_v63, 4  ;;  %v498_v10 = vadd.f32 %v497_v0, %v496_v60  ;;  %v474_v11 = vmul.f32 %v456_v7, %v1028_v59 }
 0x114   : > { %v492_v12 = vrot.slane %v491_v5, 2  ;;  %v517_v13 = vadd.f32 %v473_v6, %v471_v2 }
 0x115   : > { %v499_v14 = vrot.slane %v498_v10, 2  ;;  %v524_v15 = vadd.f32 %v474_v11, %v472_v4  ;;  %v546_v16 = vsel %vm543_vm1, %v509_v8, %v541_v9 }
 0x116   : > { %v493_v17 = vadd.f32 %v492_v12, %v491_v5  ;;  %v518_v53 = vrot.slane %v517_v13, 4  ;;  %v553_v33 = vrot.slane %v546_v16, 6 }
 0x117   : > { %v500_v18 = vadd.f32 %v499_v14, %v498_v10  ;;  %v525_v56 = vrot.slane %v524_v15, 4 }
 0x118   : > { %v519_v19 = vadd.f32 %v518_v53, %v517_v13  ;;  %v494_v55 = vrot.slane %v493_v17, 1 }
 0x119   : > { %v501_v20 = vrot.slane %v500_v18, 1  ;;  %v526_v3 = vadd.f32 %v525_v56, %v524_v15 }
 0x11a   : > { %v520_v21 = vrot.slane %v519_v19, 2  ;;  %v495_v24 = vadd.f32 %v494_v55, %v493_v17 }
 0x11b   : > { %v502_v22 = vadd.f32 %v501_v20, %v500_v18  ;;  %v527_v59 = vrot.slane %v526_v3, 2 }
 0x11c   : > { %v521_v23 = vadd.f32 %v520_v21, %v519_v19 }
 0x11d   : > { %v540_v25 = vrot.slane %v502_v22, 4  ;;  %v528_v26 = vadd.f32 %v527_v59, %v526_v3 }
 0x11e   : > { %v522_v27 = vrot.slane %v521_v23, 1 }
 0x11f   : > { %v529_v28 = vrot.slane %v528_v26, 1  ;;  %v545_v29 = vsel %vm543_vm1, %v495_v24, %v540_v25 }
 0x120   : > { %v548_v30 = vrot.slane %v545_v29, 7  ;;  %v523_v34 = vadd.f32 %v522_v27, %v521_v23 }
 0x121   : > { %v530_v31 = vadd.f32 %v529_v28, %v528_v26 }
 0x122   : > { %v550_v32 = vsel %vm549_vm3, %v548_v30, %v544_v61 }
 0x123   : > { %v542_v35 = vrot.slane %v530_v31, 4  ;;  %v552_v36 = vsel %vm551_vm4, %v548_v30, %v550_v32 }
 0x124   : > { %v555_v37 = vsel %vm554_vm5, %v553_v33, %v552_v36 }
 0x125   : > { %v547_v38 = vsel %vm543_vm1, %v523_v34, %v542_v35  ;;  %v557_v39 = vsel %vm556_vm6, %v553_v33, %v555_v37 }
 0x126   : > { %v558_v40 = vrot.slane %v547_v38, 5 }
 0x128   : > { %v560_v41 = vsel %vm559_vm7, %v558_v40, %v557_v39 }
 0x129   : > { %v562_v42 = vsel %vm561_vm8, %v558_v40, %v560_v41 }
 0x12a   : > { %564 = vst [vmem:[%s164_s12] sm:$0xff] %v562_v42 }
 0x12b   : > { %832 = shalt.err (!%p829_p9)
}
 0x12c   : > { %725 = dma.vmem_to_hbm [thread:$0]  (%p946_p4), %s582_s7, 128, %s584_s8, %s566_s15  }
 0x12d PF: > { %p737_p10 = scmp.ge.s32.totalorder %s887_s14, 2  ;;  %s595_s27 = sand.u32 1, %s867_s9  }
 0x12e   : > { %s596_s28 = scalar_lea.sflag [#allocation3], %s595_s27 }
 0x12f   : > { %p732_p11 = pnand %p737_p10, %p953_p8 }
 0x131   : > { %p733_p12 = pneg %p732_p11 }
 0x133   : > { %862 = dma.done.wait (%p733_p12), %s596_s28, 128  }
 0x134   : > { %864 = vsyncadd (%p733_p12), %s596_s28, 4294967168  ;;  %s16_s14 = sadd.s32 1, %s887_s14   ;;  %s1114_s9 = smov %s871_s10 }
 0x135   : > { %p13_p13 = scmp.ge.s32.totalorder %s16_s14, 4   ;;  %s1115_s10 = smov %s875_s11 }
 0x136   : > { %s1116_s11 = smov %s959_s22  ;;  %s1117_s12 = smov %s883_s13 }
 0x137   : > { %s1118_s13 = smov %s1120_s17  ;;  %15 = sbr.rel (!%p13_p13) target bundleno = 5 (0x5), region = 68 }
 0x13c   :  { %602 = vsyncpa [#allocation3], 1 }
 0x13d   :  { %604 = vsyncpa [#allocation3 + $0x1], 1 }
 0x13e   :  { %605 = vsyncpa [#allocation4], 1 }
 0x13f   :  { %607 = vsyncpa [#allocation4 + $0x1], 1 }

</bundles_post_ra>
